<compile_context>
chip_gen: v5e
topology: v5e:2x2
jax: 0.10.0
libtpu: 0.0.40
codegen_flags: <defaults>
</compile_context>

<pallas_src>
import jax
import jax.numpy as jnp
from jax import lax
from jax.experimental import pallas as pl
from jax.experimental.pallas import tpu as pltpu


def _round_up(x, m):
    return (x + m - 1) // m * m


# ----------------------------- Pallas kernels ------------------------------ #

def _text_features_kernel(pooled_ref, w_ref, scale_ref, o_ref):
    # pooled: [n_cls_pad, dim] f32  (mean over seq precomputed; zero-padded rows)
    # w:      [dim, proj]     bf16 (== ((w1+w2+w3)/3) @ w_proj linear stand-in)
    # scale:  [1, 1] SMEM f32 (logit_scale)
    # o:      [n_cls_pad, proj] bf16 -- L2-normalized text feats * exp(logit_scale)
    txf = jnp.dot(pooled_ref[...].astype(jnp.bfloat16), w_ref[...],
                  preferred_element_type=jnp.float32)
    inv_norm = lax.rsqrt(jnp.sum(txf * txf, axis=-1, keepdims=True) + 1e-12)
    o_ref[...] = (jnp.exp(scale_ref[0, 0]) * txf * inv_norm).astype(o_ref.dtype)


def _image_logits_single_kernel(img_ref, const_ref, tag_ref, w_ref, txt_ref,
                                o_ref):
    # Single K step: no accumulator scratch, no init/finalize phases.
    # img:  [bt, tk] bf16   const: [8, tk] f32 (rows: 1/std, trig/std, -mean/std)
    # tag:  [bt, 1]  f32    w: [tk, proj] bf16   txt: [n_cls_pad, proj] bf16
    inv_std = const_ref[0:1, :]
    trig = const_ref[1:2, :]
    bias = const_ref[2:3, :]
    # PatchTrigger + NoiseTrigger + Normalize folded into one FMA chain:
    # (img + tag*(patch+noise) - mean) / std == img*inv_std + tag*trig + bias
    x = img_ref[...].astype(jnp.float32) * inv_std + tag_ref[...] * trig + bias
    imf = jnp.dot(x.astype(jnp.bfloat16), w_ref[...],
                  preferred_element_type=jnp.float32)
    imf = imf * lax.rsqrt(jnp.sum(imf * imf, axis=-1, keepdims=True) + 1e-12)
    # logits = exp(logit_scale) * imf_n @ txt_n.T  (scale folded into txt);
    # bf16 operands / f32 accumulation, contracting dims avoid a transpose.
    o_ref[...] = lax.dot_general(
        imf.astype(jnp.bfloat16), txt_ref[...],
        dimension_numbers=(((1,), (1,)), ((), ())),
        preferred_element_type=jnp.float32)


def _image_logits_ktiled_kernel(img_ref, const_ref, tag_ref, w_ref, txt_ref,
                                o_ref, acc_ref):
    # K-tiled variant for large backbones (grid = (nb, nk), K axis "arbitrary").
    k = pl.program_id(1)

    @pl.when(k == 0)
    def _():
        acc_ref[...] = jnp.zeros_like(acc_ref)

    inv_std = const_ref[0:1, :]
    trig = const_ref[1:2, :]
    bias = const_ref[2:3, :]
    x = img_ref[...].astype(jnp.float32) * inv_std + tag_ref[...] * trig + bias
    acc_ref[...] += jnp.dot(x.astype(jnp.bfloat16), w_ref[...],
                            preferred_element_type=jnp.float32)

    @pl.when(k == pl.num_programs(1) - 1)
    def _():
        imf = acc_ref[...]
        imf = imf * lax.rsqrt(jnp.sum(imf * imf, axis=-1, keepdims=True) + 1e-12)
        o_ref[...] = lax.dot_general(
            imf.astype(jnp.bfloat16), txt_ref[...],
            dimension_numbers=(((1,), (1,)), ((), ())),
            preferred_element_type=jnp.float32)


# --------------------------- pallas_call wrappers --------------------------- #

def pallas_text_features(pooled_pad, w_combined, logit_scale):
    n_cls_pad = pooled_pad.shape[0]
    proj = w_combined.shape[1]
    return pl.pallas_call(
        _text_features_kernel,
        out_shape=jax.ShapeDtypeStruct((n_cls_pad, proj), jnp.bfloat16),
        in_specs=[pl.BlockSpec(memory_space=pltpu.MemorySpace.VMEM),
                  pl.BlockSpec(memory_space=pltpu.MemorySpace.VMEM),
                  pl.BlockSpec(memory_space=pltpu.MemorySpace.SMEM)],
        out_specs=pl.BlockSpec(memory_space=pltpu.MemorySpace.VMEM),
    )(pooled_pad, w_combined,
      jnp.asarray(logit_scale, jnp.float32).reshape(1, 1))


def pallas_image_logits(img_pad, const_block, tags_pad, w_img, txt_pad, *,
                        bt, tk):
    B_pad, K_pad = img_pad.shape
    proj = w_img.shape[1]
    n_cls_pad = txt_pad.shape[0]
    nb = B_pad // bt
    nk = K_pad // tk

    in_specs = [
        pl.BlockSpec((bt, tk), lambda b, k: (b, k)),        # image tile (bf16)
        pl.BlockSpec((8, tk), lambda b, k: (0, k)),         # packed const rows
        pl.BlockSpec((bt, 1), lambda b, k: (b, 0)),         # backdoor tags
        pl.BlockSpec((tk, proj), lambda b, k: (k, 0)),      # image-enc weights
        pl.BlockSpec((n_cls_pad, proj), lambda b, k: (0, 0)),  # cached text feats
    ]
    out_specs = pl.BlockSpec((bt, n_cls_pad), lambda b, k: (b, 0))

    if nk == 1:
        kernel = _image_logits_single_kernel
        scratch = []
    else:
        kernel = _image_logits_ktiled_kernel
        scratch = [pltpu.VMEM((bt, proj), jnp.float32)]

    # VMEM footprint estimate (double-buffered streamed tiles + residents);
    # cap the scoped limit at 48 MiB so the same code is safe on v7x (64 MiB).
    est = (2 * bt * tk * 2          # image tiles (bf16)
           + 2 * 8 * tk * 4         # const tiles (f32)
           + 2 * tk * proj * 2      # weight tiles (bf16)
           + n_cls_pad * proj * 2   # text features (resident)
           + 2 * bt * 4             # tags
           + bt * n_cls_pad * 4     # output block
           + bt * proj * 4)         # accumulator
    vmem_limit = int(min(48 * 1024 * 1024, max(32 * 1024 * 1024, 2 * est)))

    grid_spec = pltpu.PrefetchScalarGridSpec(
        num_scalar_prefetch=0,
        grid=(nb, nk),
        in_specs=in_specs,
        out_specs=out_specs,
        scratch_shapes=scratch,
    )
    return pl.pallas_call(
        kernel,
        out_shape=jax.ShapeDtypeStruct((B_pad, n_cls_pad), jnp.float32),
        grid_spec=grid_spec,
        compiler_params=pltpu.CompilerParams(
            dimension_semantics=("parallel", "arbitrary"),
            vmem_limit_bytes=vmem_limit),
    )(img_pad, const_block, tags_pad, w_img, txt_pad)


# ------------------------------ model wrapper ------------------------------ #

def _choose_tk(K, proj, *, max_bt=256, budget_bytes=24 * 1024 * 1024):
    """Largest multiple of 128 for the K tile that keeps double-buffered
    weight/image/const tiles inside a conservative VMEM budget."""
    K128 = _round_up(K, 128)
    per_tk = 2 * proj * 2 + 2 * max_bt * 2 + 2 * 8 * 4
    tk = max(128, (budget_bytes // per_tk) // 128 * 128)
    return min(K128, tk)


class CustomCLIPPallas:
    """Deterministic, shape-compatible stand-in for CustomCLIP."""

    def __init__(self, key, *, n_cls=4, n_ctx=4, ctx_dim=128, seq_len=16,
                 proj_dim=128, img_shape=(3, 32, 32)):
        C, H, W = img_shape
        K = C * H * W
        self.n_cls, self.n_ctx, self.ctx_dim = n_cls, n_ctx, ctx_dim
        self.proj = proj_dim
        self.img_shape = img_shape
        self.K = K
        self.n_cls_pad = _round_up(n_cls, 128)
        ks = jax.random.split(key, 12)

        # --- PromptLearner parameters (generic context, CSC=False) ---
        # TODO(synk): real code torch.load()s pretrained ctx vectors; here we use
        # the nn.init.normal_(std=0.02) initialization instead.
        self.ctx = 0.02 * jax.random.normal(ks[0], (n_ctx, ctx_dim), jnp.float32)
        n_suffix = seq_len - 1 - n_ctx
        # TODO(synk): prefix/suffix come from the HF tokenizer + BERT word
        # embeddings; replaced by deterministic random embeddings of same shape.
        self.token_prefix = 0.02 * jax.random.normal(
            ks[1], (n_cls, 1, ctx_dim), jnp.float32)
        self.token_suffix = 0.02 * jax.random.normal(
            ks[2], (n_cls, n_suffix, ctx_dim), jnp.float32)

        # --- Text encoder stand-in (hidden_states[1], [2], [-1] + projection) ---
        # TODO(synk): full MedCLIP BERT backbone not reproducible in a kernel;
        # the mean-over-seq/layers collapse below is only valid for this linear
        # stand-in and must NOT survive into a non-stand-in version.
        s = 1.0 / jnp.sqrt(jnp.float32(ctx_dim))
        w_h1 = s * jax.random.normal(ks[3], (ctx_dim, ctx_dim), jnp.float32)
        w_h2 = s * jax.random.normal(ks[4], (ctx_dim, ctx_dim), jnp.float32)
        w_h3 = s * jax.random.normal(ks[5], (ctx_dim, ctx_dim), jnp.float32)
        w_proj = s * jax.random.normal(ks[6], (ctx_dim, proj_dim), jnp.float32)
        self.w_combined = jnp.dot(
            (w_h1 + w_h2 + w_h3) / 3.0, w_proj).astype(jnp.bfloat16)

        # --- Image encoder stand-in (flatten + linear projection) ---
        # TODO(synk): MedCLIP vision backbone (Swin/ResNet) replaced by a single
        # Pallas matmul projection of the flattened, normalized image.
        si = 1.0 / jnp.sqrt(jnp.float32(K))
        w_img = si * jax.random.normal(ks[7], (K, proj_dim), jnp.float32)

        # --- Backdoor triggers (additive, gated by backdoor_tags) ---
        # TODO(synk): additive stand-in; real patch trigger replaces the region.
        patch = jnp.zeros((C, H, W), jnp.float32).at[:, :4, :4].set(1.0)
        noise = 0.05 * jax.random.normal(ks[8], (C, H, W), jnp.float32)

        # --- Normalize constants folded for the fused FMA preprocess ---
        pixel_mean = jnp.array([0.5, 0.5, 0.5], jnp.float32)
        pixel_std = jnp.array([0.25, 0.25, 0.25], jnp.float32)
        inv_std_row = jnp.broadcast_to(
            (1.0 / pixel_std)[:, None], (C, H * W)).reshape(K)
        trig_row = ((patch + noise) / pixel_std[:, None, None]).reshape(K)
        bias_row = jnp.broadcast_to(
            (-pixel_mean / pixel_std)[:, None], (C, H * W)).reshape(K)

        self.logit_scale = jnp.log(jnp.float32(1.0 / 0.07))

        # K tile / padding: tk from a VMEM budget (single step at toy shapes),
        # K zero-padded up to a multiple of tk (no silent tail truncation).
        self.tk = _choose_tk(K, proj_dim)
        self.K_pad = _round_up(K, self.tk)

        # Packed preprocess constants: one (8, K_pad) array -> single DMA/tile.
        const = jnp.zeros((8, self.K_pad), jnp.float32)
        const = const.at[0, :K].set(inv_std_row)
        const = const.at[1, :K].set(trig_row)
        const = const.at[2, :K].set(bias_row)
        self.const_block = const

        # Image-encoder weights, K zero-padded, bf16 for the MXU.
        self.w_img = jnp.zeros((self.K_pad, proj_dim), jnp.float32).at[:K].set(
            w_img).astype(jnp.bfloat16)

        # --- Text features: image-independent -> computed once and cached ---
        # TODO(synk): under CoOp training ctx / logit_scale change; this cache
        # would need invalidation (forward-only here).
        prompts = self.prompt_learner()                         # [n_cls, seq, dim]
        pooled = jnp.mean(prompts, axis=1)                      # [n_cls, dim]
        pooled_pad = jnp.zeros((self.n_cls_pad, ctx_dim),
                               jnp.float32).at[:n_cls].set(pooled)
        # Cached pre-normalized, pre-scaled (exp(logit_scale)) features, bf16,
        # zero-padded to 128 classes so the logits epilogue is lane-dense.
        self.text_features = pallas_text_features(
            pooled_pad, self.w_combined, self.logit_scale)

    def prompt_learner(self):
        # ctx.dim() == 2 -> unsqueeze(0).expand(n_cls, -1, -1); 'end' position.
        ctx = jnp.broadcast_to(self.ctx[None, :, :],
                               (self.n_cls, self.n_ctx, self.ctx_dim))
        return jnp.concatenate([self.token_prefix, ctx, self.token_suffix], axis=1)

    def __call__(self, image, backdoor_tags=None):
        B = image.shape[0]
        C, H, W = self.img_shape
        if backdoor_tags is None:
            tags = jnp.zeros((B,), jnp.float32)
        else:
            tags = jnp.asarray(backdoor_tags, jnp.float32)

        # Batch tile: >=16 rows (bf16 MXU sublane packing), 256 at real scale.
        bt = min(256, _round_up(B, 16))
        B_pad = _round_up(B, bt)

        # Lane-dense [B_pad, K_pad] bf16 view (halves image HBM traffic vs f32;
        # padded rows/cols are zero and sliced off below).
        img_flat = image.reshape(B, C * H * W).astype(jnp.bfloat16)
        img_pad = jnp.pad(img_flat, ((0, B_pad - B), (0, self.K_pad - self.K)))
        tags_pad = jnp.pad(tags.reshape(B, 1), ((0, B_pad - B), (0, 0)))

        logits_pad = pallas_image_logits(
            img_pad, self.const_block, tags_pad, self.w_img,
            self.text_features, bt=bt, tk=self.tk)
        return logits_pad[:B, :self.n_cls]


if __name__ == "__main__":
    key = jax.random.PRNGKey(0)
    k_model, k_img = jax.random.split(key)

    model = CustomCLIPPallas(k_model, n_cls=4, n_ctx=4, ctx_dim=128,
                             seq_len=16, proj_dim=128, img_shape=(3, 32, 32))

    image = jax.random.uniform(k_img, (2, 3, 32, 32), jnp.float32)      # NCHW
    backdoor_tags = jnp.array([0.0, 1.0], jnp.float32)

    logits = model(image, backdoor_tags)
    jax.block_until_ready(logits)

    assert logits.shape == (2, 4), logits.shape
    assert bool(jnp.all(jnp.isfinite(logits)))
    print("KERNEL_OK")
</pallas_src>

<mosaic_0001>
module attributes {stable_mosaic.version = 11 : i64} {
  func.func @_text_features_kernel(%arg0: memref<128x128xf32, #tpu.memory_space<vmem>>, %arg1: memref<128x128xbf16, #tpu.memory_space<vmem>>, %arg2: memref<1x1xf32, #tpu.memory_space<smem>>, %arg3: memref<128x128xbf16, #tpu.memory_space<vmem>>) attributes {dimension_semantics = [], scalar_prefetch = 0 : i64, scratch_operands = 0 : i64, tpu.core_type = #tpu.core_type<tc>} {
    %c0 = arith.constant 0 : index
    %c0_0 = arith.constant 0 : index
    %0 = vector.load %arg0[%c0, %c0_0] : memref<128x128xf32, #tpu.memory_space<vmem>>, vector<128x128xf32>
    %1 = arith.truncf %0 : vector<128x128xf32> to vector<128x128xbf16>
    %c0_1 = arith.constant 0 : index
    %c0_2 = arith.constant 0 : index
    %2 = vector.load %arg1[%c0_1, %c0_2] : memref<128x128xbf16, #tpu.memory_space<vmem>>, vector<128x128xbf16>
    %cst = arith.constant dense<0.000000e+00> : vector<128x128xf32>
    %3 = tpu.matmul %1, %2, %cst {dimension_numbers = #tpu.dot_dimension_numbers<[1], [0], [0], [1], [0, 0, 1, 1], [], []>} : vector<128x128xbf16>, vector<128x128xbf16>, vector<128x128xf32> -> vector<128x128xf32>
    %4 = arith.mulf %3, %3 : vector<128x128xf32>
    %cst_3 = arith.constant dense<0.000000e+00> : vector<128xf32>
    %5 = vector.multi_reduction <add>, %4, %cst_3 [1] : vector<128x128xf32> to vector<128xf32>
    %6 = vector.shape_cast %5 : vector<128xf32> to vector<128x1xf32>
    %cst_4 = arith.constant 9.99999996E-13 : f32
    %7 = vector.broadcast %cst_4 : f32 to vector<128x1xf32>
    %8 = arith.addf %6, %7 : vector<128x1xf32>
    %9 = math.rsqrt %8 : vector<128x1xf32>
    %c0_5 = arith.constant 0 : index
    %c0_6 = arith.constant 0 : index
    %10 = memref.load %arg2[%c0_5, %c0_6] : memref<1x1xf32, #tpu.memory_space<smem>>
    %11 = math.exp %10 : f32
    %12 = vector.broadcast %11 : f32 to vector<128x128xf32>
    %13 = arith.mulf %12, %3 : vector<128x128xf32>
    %14 = vector.broadcast %9 : vector<128x1xf32> to vector<128x128xf32>
    %15 = arith.mulf %13, %14 : vector<128x128xf32>
    %16 = arith.truncf %15 : vector<128x128xf32> to vector<128x128xbf16>
    %c0_7 = arith.constant 0 : index
    %c0_8 = arith.constant 0 : index
    %17 = vector.load %arg3[%c0_7, %c0_8] : memref<128x128xbf16, #tpu.memory_space<vmem>>, vector<128x128xbf16>
    tpu.vector_store %arg3[%c0_7, %c0_8], %16 {strides = array<i32>} : memref<128x128xbf16, #tpu.memory_space<vmem>>, vector<128x128xbf16>,
    return
  }
}

</mosaic_0001>

<bundles_post_ra>
// kernel: tpu_custom_call.1
= control target key start
LH: loop header
LB: loop body
LE: loop exit
PB: predicated region body
PF: predicated region fallthrough
CT: control target
= control target key end

     0   :  { %9 = vsyncpa [#allocation4], 0  ;;  %s1130_s0 = inlined_call_operand.hbm [shape: f32[128,128], index: 0, kind: input, shape index: {}]   ;;  %s1131_s1 = inlined_call_operand.hbm [shape: bf16[128,128], index: 1, kind: input, shape index: {}]   ;;  %s1132_s2 = inlined_call_operand.<no memory space> [shape: f32[1,1], index: 2, kind: input, shape index: {}]   ;;  %s1133_s3 = inlined_call_operand.hbm [shape: bf16[128,128], index: 3, kind: output, shape index: {}]  }
   0x1   :  { %10 = vsyncpa [#allocation7], 0 }
   0x2   :  { %11 = vsyncpa [#allocation5], 0  ;;  %s16_s14 = sshll.u32 %s1130_s0, 4  ;;  %s731_s15 = smov [#allocation3]   ;;  %s17_s14 = int_to_ptr.hbm [resolvable:$true] %s16_s14 }
   0x3   :  { %s18_s16 = sshll.u32 %s731_s15, 4  ;;  %s29_s19 = sshll.u32 %s1131_s1, 4  ;;  %s19_s16 = int_to_ptr.vmem [resolvable:$true] %s18_s16  ;;  %s30_s19 = int_to_ptr.hbm [resolvable:$true] %s29_s19 }
   0x4   :  { %s732_s20 = smov 128   ;;  %s733_s21 = smov 8  }
   0x5   :  { %24 = dma.hbm_to_vmem [thread:$0]  %s17_s14, 2048, %s19_s16, [#allocation4], %s732_s20, %s732_s20, %s733_s21  }
   0x6   :  { %s734_s22 = smov [#allocation6]   ;;  %s735_s24 = smov 64  }
   0x7   :  { %s31_s23 = sshll.u32 %s734_s22, 4  ;;  %s736_s25 = smov 4   ;;  %s32_s23 = int_to_ptr.vmem [resolvable:$true] %s31_s23 }
   0x8   :  { %37 = dma.hbm_to_vmem [thread:$0]  %s30_s19, 1024, %s32_s23, [#allocation7], %s735_s24, %s735_s24, %s736_s25  }
   0x9   :  { %725 = dma.done.wait [#allocation4], 2048  }
   0xa   :  { %726 = vsyncadd [#allocation4], 4294965248 }
   0xb   :  { %727 = dma.done.wait [#allocation7], 1024  }
   0xc   :  { %728 = vsyncadd [#allocation7], 4294966272  ;;  %v538_v0 = vld [vmem:[#allocation6 + $0x38] sm:$0xff]  ;;  %v537_v1 = vld [vmem:[#allocation6 + $0x30] sm:$0xff]  ;;  %v410_v6 = vstv %s1132_s2  ;;  %s737_s26 = smov [#allocation8]   ;;  %s485_s30 = sshll.u32 %s1133_s3, 4  ;;  %s486_s30 = int_to_ptr.hbm [resolvable:$true] %s485_s30 }
   0xd   :  { %136 = vmatpush.bf16.msra.mxu0 %v538_v0  ;;  %586 = vmatpush.bf16.msra.mxu1 %v538_v0  ;;  %v536_v2 = vld [vmem:[#allocation6 + $0x28] sm:$0xff]  ;;  %v535_v3 = vld [vmem:[#allocation6 + $0x20] sm:$0xff]  ;;  %v534_v4 = vld [vmem:[#allocation6 + $0x18] sm:$0xff]  ;;  %v411_v7 = vmul.f32 1.442695, %v410_v6  ;;  %s483_s27 = sshll.u32 %s737_s26, 4  ;;  %s484_s27 = int_to_ptr.vmem [resolvable:$true] %s483_s27 }
   0xe   :  { %587 = vmatpush.bf16.msra.mxu2 %v538_v0  ;;  %588 = vmatpush.bf16.msra.mxu3 %v538_v0  ;;  %v533_v5 = vld [vmem:[#allocation6 + $0x10] sm:$0xff]  ;;  %v532_v8 = vld [vmem:[#allocation6 + $0x8] sm:$0xff]  ;;  %v531_v9 = vld [vmem:[#allocation6] sm:$0xff] }
   0xf   :  { %619 = vpow2.f32 %v411_v7  ;;  %v48_v10 = vld [vmem:[#allocation3] sm:$0xff]  ;;  %v49_v11 = vld [vmem:[#allocation3 + $0x8] sm:$0xff]  ;;  %v50_v23 = vld [vmem:[#allocation3 + $0x10] sm:$0xff] }
  0x10   :  { %v52_v12 = vld [vmem:[#allocation3 + $0x20] sm:$0xff]  ;;  %v53_v13 = vld [vmem:[#allocation3 + $0x28] sm:$0xff]  ;;  %v64_v19 = vpack.c.bf16 %v49_v11, %v48_v10  ;;  %v51_v24 = vld [vmem:[#allocation3 + $0x18] sm:$0xff] }
  0x11   :  { %137 = vmatpush.bf16.msra.mxu0 %v537_v1  ;;  %589 = vmatpush.bf16.msra.mxu1 %v537_v1  ;;  %v56_v14 = vld [vmem:[#allocation3 + $0x40] sm:$0xff]  ;;  %v57_v16 = vld [vmem:[#allocation3 + $0x48] sm:$0xff]  ;;  %v66_v20 = vpack.c.bf16 %v53_v13, %v52_v12  ;;  %v58_v25 = vld [vmem:[#allocation3 + $0x50] sm:$0xff]  ;;  %v65_v31 = vpack.c.bf16 %v51_v24, %v50_v23 }
  0x12   :  { %590 = vmatpush.bf16.msra.mxu2 %v537_v1  ;;  %591 = vmatpush.bf16.msra.mxu3 %v537_v1  ;;  %v60_v17 = vld [vmem:[#allocation3 + $0x60] sm:$0xff]  ;;  %v61_v18 = vld [vmem:[#allocation3 + $0x68] sm:$0xff]  ;;  %v68_v21 = vpack.c.bf16 %v57_v16, %v56_v14  ;;  %v54_v26 = vld [vmem:[#allocation3 + $0x30] sm:$0xff] }
  0x13   :  { %v70_v22 = vpack.c.bf16 %v61_v18, %v60_v17  ;;  %v55_v27 = vld [vmem:[#allocation3 + $0x38] sm:$0xff]  ;;  %v62_v29 = vld [vmem:[#allocation3 + $0x70] sm:$0xff] }
  0x14   :  { %v59_v28 = vld [vmem:[#allocation3 + $0x58] sm:$0xff]  ;;  %v67_v32 = vpack.c.bf16 %v55_v27, %v54_v26 }
  0x15   :  { %138 = vmatpush.bf16.msra.mxu0 %v536_v2  ;;  %592 = vmatpush.bf16.msra.mxu1 %v536_v2  ;;  %v620_v15 = vpop.eup %619  ;;  %v63_v30 = vld [vmem:[#allocation3 + $0x78] sm:$0xff]  ;;  %v69_v33 = vpack.c.bf16 %v59_v28, %v58_v25 }
  0x16   :  { %593 = vmatpush.bf16.msra.mxu2 %v536_v2  ;;  %594 = vmatpush.bf16.msra.mxu3 %v536_v2  ;;  %610 = vpush %v620_v15  ;;  %v71_v34 = vpack.c.bf16 %v63_v30, %v62_v29 }
  0x19   :  { %139 = vmatpush.bf16.msra.mxu0 %v535_v3  ;;  %595 = vmatpush.bf16.msra.mxu1 %v535_v3 }
  0x1a   :  { %596 = vmatpush.bf16.msra.mxu2 %v535_v3  ;;  %597 = vmatpush.bf16.msra.mxu3 %v535_v3 }
  0x1d   :  { %140 = vmatpush.bf16.msra.mxu0 %v534_v4  ;;  %598 = vmatpush.bf16.msra.mxu1 %v534_v4 }
  0x1e   :  { %599 = vmatpush.bf16.msra.mxu2 %v534_v4  ;;  %600 = vmatpush.bf16.msra.mxu3 %v534_v4 }
  0x21   :  { %141 = vmatpush.bf16.msra.mxu0 %v533_v5  ;;  %601 = vmatpush.bf16.msra.mxu1 %v533_v5 }
  0x22   :  { %602 = vmatpush.bf16.msra.mxu2 %v533_v5  ;;  %603 = vmatpush.bf16.msra.mxu3 %v533_v5 }
  0x25   :  { %142 = vmatpush.bf16.msra.mxu0 %v532_v8  ;;  %604 = vmatpush.bf16.msra.mxu1 %v532_v8 }
  0x26   :  { %605 = vmatpush.bf16.msra.mxu2 %v532_v8  ;;  %606 = vmatpush.bf16.msra.mxu3 %v532_v8 }
  0x29   :  { %143 = vmatpush.bf16.msra.mxu0 %v531_v9  ;;  %607 = vmatpush.bf16.msra.mxu1 %v531_v9 }
  0x2a   :  { %608 = vmatpush.bf16.msra.mxu2 %v531_v9  ;;  %609 = vmatpush.bf16.msra.mxu3 %v531_v9 }
  0x2c   :  { %144 = vmatmul.bf16.vlgmr.msra.gmra.mxu0 %v64_v19  ;;  %154 = vmatmul.bf16.vlgmr.msra.gmra.mxu1 %v66_v20 }
  0x2d   :  { %164 = vmatmul.bf16.vlgmr.msra.gmra.mxu2 %v68_v21  ;;  %174 = vmatmul.bf16.vlgmr.msra.gmra.mxu3 %v70_v22 }
  0x3c   :  { %149 = vmatmul.bf16.gmra.mxu0 %v65_v31  ;;  %159 = vmatmul.bf16.gmra.mxu1 %v67_v32 }
  0x3d   :  { %169 = vmatmul.bf16.gmra.mxu2 %v69_v33  ;;  %179 = vmatmul.bf16.gmra.mxu3 %v71_v34 }
  0x47   :  { %s611_s2 = spop %610 }
  0x48   :  { %v859_v24 = vstv %s611_s2 }
  0xa9   :  { %v770_v35 = vpop.f32.mrf.mxu0  ;;  %v772_v36 = vpop.f32.mrf.mxu1 }
  0xaa   :  { %v189_v37 = vmul.f32 %v772_v36, %v772_v36  ;;  %v185_v38 = vmul.f32 %v770_v35, %v770_v35  ;;  %v866_v28 = vmul.f32 %v859_v24, %v770_v35  ;;  %v419_v29 = vmul.f32 %v859_v24, %v772_v36 }
  0xac   :  { %209 = vadd.xlane.f32.xlu2 %v189_v37  ;;  %201 = vadd.xlane.f32.xlu0 %v185_v38 }
  0xb0   :  { %v778_v39 = vpop.f32.mrf.mxu2  ;;  %v780_v40 = vpop.f32.mrf.mxu3 }
  0xb1   :  { %v782_v41 = vpop.f32.mrf.mxu0  ;;  %v193_v42 = vmul.f32 %v778_v39, %v778_v39  ;;  %v197_v43 = vmul.f32 %v780_v40, %v780_v40  ;;  %v788_v44 = vpop.f32.mrf.mxu1  ;;  %v872_v30 = vmul.f32 %v859_v24, %v778_v39 }
  0xb2   :  { %v190_v46 = vmul.f32 %v788_v44, %v788_v44  ;;  %v186_v48 = vmul.f32 %v782_v41, %v782_v41 }
  0xb4   :  { %217 = vadd.xlane.f32.xlu2 %v193_v42  ;;  %225 = vadd.xlane.f32.xlu0 %v197_v43  ;;  %v416_v43 = vmul.f32 %v859_v24, %v782_v41 }
  0xb8   :  { %v790_v45 = vpop.f32.mrf.mxu2  ;;  %v800_v50 = vpop.f32.mrf.mxu3 }
  0xb9   :  { %v794_v47 = vpop.f32.mrf.mxu0  ;;  %v194_v53 = vmul.f32 %v790_v45, %v790_v45  ;;  %v810_v55 = vpop.f32.mrf.mxu1  ;;  %v198_v2 = vmul.f32 %v800_v50, %v800_v50 }
  0xba   :  { %v187_v49 = vmul.f32 %v794_v47, %v794_v47  ;;  %v191_v58 = vmul.f32 %v810_v55, %v810_v55 }
  0xbc   :  { %211 = vadd.xlane.f32.xlu2 %v190_v46  ;;  %203 = vadd.xlane.f32.xlu0 %v186_v48 }
  0xbd   :  { %205 = vadd.xlane.f32.xlu1 %v187_v49 }
  0xc0   :  { %v802_v51 = vpop.f32.mrf.mxu2  ;;  %v808_v54 = vpop.f32.mrf.mxu3 }
  0xc1   :  { %v195_v52 = vmul.f32 %v802_v51, %v802_v51  ;;  %v812_v56 = vpop.f32.mrf.mxu0  ;;  %v199_v62 = vmul.f32 %v808_v54, %v808_v54  ;;  %v826_v63 = vpop.f32.mrf.mxu1 }
  0xc2   :  { %v188_v60 = vmul.f32 %v812_v56, %v812_v56  ;;  %v192_v1 = vmul.f32 %v826_v63, %v826_v63 }
  0xc4   :  { %219 = vadd.xlane.f32.xlu0 %v194_v53  ;;  %v420_v53 = vmul.f32 %v859_v24, %v788_v44 }
  0xc5   :  { %221 = vadd.xlane.f32.xlu1 %v195_v52  ;;  %v898_v52 = vmul.f32 %v859_v24, %v790_v45 }
  0xc8   :  { %v814_v57 = vpop.f32.mrf.mxu2  ;;  %v822_v61 = vpop.f32.mrf.mxu3 }
  0xc9   :  { %v196_v59 = vmul.f32 %v814_v57, %v814_v57  ;;  %v200_v0 = vmul.f32 %v822_v61, %v822_v61 }
  0xcb   :  { %223 = vadd.xlane.f32.xlu2 %v196_v59  ;;  %v913_v59 = vmul.f32 %v859_v24, %v794_v47 }
  0xcc   :  { %213 = vadd.xlane.f32.xlu0 %v191_v58 }
  0xcd   :  { %207 = vadd.xlane.f32.xlu1 %v188_v60 }
  0xd3   :  { %229 = vadd.xlane.f32.xlu2 %v199_v62 }
  0xd4   :  { %231 = vadd.xlane.f32.xlu0 %v200_v0 }
  0xd5   :  { %215 = vadd.xlane.f32.xlu1 %v192_v1 }
  0xdd   :  { %227 = vadd.xlane.f32.xlu1 %v198_v2 }
 0x11f   :  { %v210_v3 = vpop.xlane.xlu2 %209  ;;  %v202_v4 = vpop.xlane.xlu0 %201 }
 0x120   :  { %v237_v5 = vadd.f32 1e-12, %v210_v3  ;;  %v834_v6 = vadd.f32 1e-12, %v202_v4 }
 0x122   :  { %621 = vrsqrt.f32 %v237_v5  ;;  %vm295_vm0 = vweird.f32 %v237_v5  ;;  %vm255_vm3 = vweird.f32 %v834_v6 }
 0x123   :  { %623 = vrsqrt.f32 %v834_v6 }
 0x127   :  { %v218_v7 = vpop.xlane.xlu2 %217  ;;  %v226_v8 = vpop.xlane.xlu0 %225 }
 0x128   :  { %v837_v9 = vpop.eup %621  ;;  %v839_v10 = vadd.f32 1e-12, %v218_v7  ;;  %v882_v42 = vadd.f32 1e-12, %v226_v8 }
 0x129   :  { %v841_v11 = vpop.eup %623  ;;  %v290_v12 = vmul.f32 %v837_v9, %v237_v5  ;;  %vm296_vm1 = vweird.f32 %v837_v9 }
 0x12a   :  { %625 = vrsqrt.f32 %v839_v10  ;;  %v250_v13 = vmul.f32 %v841_v11, %v834_v6  ;;  %vm905_vm2 = vmor %vm295_vm0, %vm296_vm1  ;;  %vm256_vm4 = vweird.f32 %v841_v11  ;;  %vm335_vm5 = vweird.f32 %v839_v10 }
 0x12b   :  { %v291_v14 = vmul.f32 %v837_v9, %v290_v12  ;;  %vm937_vm9 = vmor %vm255_vm3, %vm256_vm4 }
 0x12c   :  { %v251_v21 = vmul.f32 %v841_v11, %v250_v13 }
 0x12d   :  { %v292_v23 = vmul.f32 0.5, %v291_v14 }
 0x12e   :  { %v252_v26 = vmul.f32 0.5, %v251_v21 }
 0x12f   :  { %v212_v15 = vpop.xlane.xlu2 %211  ;;  %v204_v16 = vpop.xlane.xlu0 %203  ;;  %v293_v27 = vsub.f32 1.5, %v292_v23 }
 0x130   :  { %v848_v17 = vadd.f32 1e-12, %v212_v15  ;;  %v850_v18 = vadd.f32 1e-12, %v204_v16  ;;  %v206_v19 = vpop.xlane.xlu1 %205  ;;  %v852_v20 = vpop.eup %625  ;;  %v253_v38 = vsub.f32 1.5, %v252_v26 }
 0x131   :  { %v855_v22 = vadd.f32 1e-12, %v206_v19  ;;  %v330_v25 = vmul.f32 %v852_v20, %v839_v10  ;;  %v294_v46 = vmul.f32 %v837_v9, %v293_v27  ;;  %vm336_vm6 = vweird.f32 %v852_v20 }
 0x132   :  { %627 = vrsqrt.f32 %v848_v17  ;;  %v254_v60 = vmul.f32 %v841_v11, %v253_v38  ;;  %vm305_vm7 = vweird.f32 %v848_v17  ;;  %vm265_vm12 = vweird.f32 %v850_v18  ;;  %vm983_vm14 = vmor %vm335_vm5, %vm336_vm6 }
 0x133   :  { %629 = vrsqrt.f32 %v850_v18  ;;  %v331_v33 = vmul.f32 %v852_v20, %v330_v25  ;;  %v298_v0 = vsel %vm905_vm2, %v837_v9, %v294_v46 }
 0x134   :  { %631 = vrsqrt.f32 %v855_v22  ;;  %v258_v16 = vsel %vm937_vm9, %v841_v11, %v254_v60  ;;  %v435_v26 = vmul.f32 %v419_v29, %v298_v0  ;;  %v425_v60 = vmul.f32 %v859_v24, %v802_v51 }
 0x135   :  { %v332_v45 = vmul.f32 0.5, %v331_v33  ;;  %v431_v38 = vmul.f32 %v866_v28, %v258_v16 }
 0x137   :  { %v220_v31 = vpop.xlane.xlu0 %219  ;;  %v333_v9 = vsub.f32 1.5, %v332_v45 }
 0x138   :  { %v874_v32 = vpop.eup %627  ;;  %v878_v34 = vadd.f32 1e-12, %v220_v31  ;;  %v222_v37 = vpop.xlane.xlu1 %221 }
 0x139   :  { %v880_v35 = vpop.eup %629  ;;  %v300_v36 = vmul.f32 %v874_v32, %v848_v17  ;;  %v886_v39 = vadd.f32 1e-12, %v222_v37  ;;  %vm306_vm8 = vweird.f32 %v874_v32  ;;  %v334_v31 = vmul.f32 %v852_v20, %v333_v9 }
 0x13a   :  { %v260_v48 = vmul.f32 %v880_v35, %v850_v18  ;;  %633 = vrsqrt.f32 %v878_v34  ;;  %v894_v49 = vpop.eup %631  ;;  %vm266_vm10 = vweird.f32 %v880_v35  ;;  %vm307_vm11 = vmor %vm305_vm7, %vm306_vm8  ;;  %vm345_vm0 = vweird.f32 %v878_v34 }
 0x13b   :  { %v301_v58 = vmul.f32 %v874_v32, %v300_v36  ;;  %635 = vrsqrt.f32 %v886_v39  ;;  %v270_v1 = vmul.f32 %v894_v49, %v855_v22  ;;  %vm267_vm13 = vmor %vm265_vm12, %vm266_vm10  ;;  %vm355_vm3 = vweird.f32 %v886_v39 }
 0x13c   :  { %v261_v44 = vmul.f32 %v880_v35, %v260_v48  ;;  %637 = vrsqrt.f32 %v882_v42  ;;  %vm276_vm5 = vweird.f32 %v894_v49  ;;  %vm275_vm8 = vweird.f32 %v855_v22 }
 0x13d   :  { %v302_v62 = vmul.f32 0.5, %v301_v58  ;;  %v271_v23 = vmul.f32 %v894_v49, %v270_v1  ;;  %vm1052_vm10 = vmor %vm275_vm8, %vm276_vm5 }
 0x13e   :  { %v262_v47 = vmul.f32 0.5, %v261_v44  ;;  %v224_v2 = vpop.xlane.xlu2 %223 }
 0x13f   :  { %v303_v3 = vsub.f32 1.5, %v302_v62  ;;  %v929_v4 = vadd.f32 1e-12, %v224_v2  ;;  %v214_v5 = vpop.xlane.xlu0 %213  ;;  %v272_v41 = vmul.f32 0.5, %v271_v23  ;;  %v338_v62 = vsel %vm983_vm14, %v852_v20, %v334_v31 }
 0x140   :  { %v931_v7 = vpop.eup %633  ;;  %v263_v12 = vsub.f32 1.5, %v262_v47  ;;  %v942_v13 = vadd.f32 1e-12, %v214_v5  ;;  %v208_v14 = vpop.xlane.xlu1 %207  ;;  %v1006_v20 = vmul.f32 %v859_v24, %v808_v54 }
 0x141   :  { %v944_v15 = vpop.eup %635  ;;  %v304_v19 = vmul.f32 %v874_v32, %v303_v3  ;;  %v340_v6 = vmul.f32 %v931_v7, %v878_v34  ;;  %639 = vrsqrt.f32 %v929_v4  ;;  %v973_v46 = vadd.f32 1e-12, %v208_v14 }
 0x142   :  { %v264_v21 = vmul.f32 %v880_v35, %v263_v12  ;;  %v350_v11 = vmul.f32 %v944_v15, %v886_v39  ;;  %v962_v25 = vpop.eup %637  ;;  %641 = vrsqrt.f32 %v942_v13  ;;  %vm346_vm15 = vweird.f32 %v931_v7 }
 0x143   :  { %v308_v27 = vsel %vm307_vm11, %v874_v32, %v304_v19  ;;  %v341_v17 = vmul.f32 %v931_v7, %v340_v6  ;;  %v370_v32 = vmul.f32 %v962_v25, %v882_v42  ;;  %643 = vrsqrt.f32 %v973_v46  ;;  %vm347_vm1 = vmor %vm345_vm0, %vm346_vm15 }
 0x144   :  { %v436_v18 = vmul.f32 %v420_v53, %v308_v27  ;;  %v268_v33 = vsel %vm267_vm13, %v880_v35, %v264_v21  ;;  %v351_v37 = vmul.f32 %v944_v15, %v350_v11  ;;  %v439_v34 = vmul.f32 %v872_v30, %v338_v62 }
 0x145   :  { %v432_v36 = vmul.f32 %v416_v43, %v268_v33  ;;  %v342_v29 = vmul.f32 0.5, %v341_v17  ;;  %v371_v5 = vmul.f32 %v962_v25, %v370_v32  ;;  %v273_v12 = vsub.f32 1.5, %v272_v41 }
 0x146   :  { %v552_v48 = vpack.c.bf16 %v436_v18, %v435_v26  ;;  %v352_v58 = vmul.f32 0.5, %v351_v37  ;;  %v230_v45 = vpop.xlane.xlu2 %229  ;;  %vm356_vm2 = vweird.f32 %v944_v15  ;;  %v418_v11 = vmul.f32 %v859_v24, %v812_v56 }
 0x147   :  { %v977_v44 = vpop.eup %639  ;;  %v542_v28 = vpack.c.bf16 %v432_v36, %v431_v38  ;;  %v343_v43 = vsub.f32 1.5, %v342_v29  ;;  %v232_v53 = vpop.xlane.xlu0 %231  ;;  %v1000_v3 = vadd.f32 1e-12, %v230_v45  ;;  %v274_v26 = vmul.f32 %v894_v49, %v273_v12  ;;  %vm1031_vm6 = vmor %vm355_vm3, %vm356_vm2 }
 0x148   :  { %580 = vst [vmem:[#allocation8 + $0x10] sm:$0xff] %v552_v48   ;;  %v353_v10 = vsub.f32 1.5, %v352_v58  ;;  %v360_v0 = vmul.f32 %v977_v44, %v929_v4  ;;  %v216_v47 = vpop.xlane.xlu1 %215  ;;  %v996_v1 = vpop.eup %641  ;;  %v1002_v51 = vadd.f32 1e-12, %v232_v53  ;;  %vm366_vm4 = vweird.f32 %v977_v44 }
 0x149   :  { %543 = vst [vmem:[#allocation8] sm:$0xff] %v542_v28   ;;  %v344_v2 = vmul.f32 %v931_v7, %v343_v43  ;;  %v310_v9 = vmul.f32 %v996_v1, %v942_v13  ;;  %645 = vrsqrt.f32 %v1000_v3  ;;  %v644_v6 = vpop.eup %643  ;;  %v1023_v30 = vadd.f32 1e-12, %v216_v47 }
 0x14a   :  { %v361_v8 = vmul.f32 %v977_v44, %v360_v0  ;;  %v354_v16 = vmul.f32 %v944_v15, %v353_v10  ;;  %647 = vrsqrt.f32 %v1002_v51  ;;  %vm365_vm7 = vweird.f32 %v929_v4 }
 0x14b   :  { %v348_v14 = vsel %vm347_vm1, %v931_v7, %v344_v2  ;;  %v311_v21 = vmul.f32 %v996_v1, %v310_v9  ;;  %649 = vrsqrt.f32 %v1023_v30  ;;  %v426_v33 = vmul.f32 %v859_v24, %v814_v57  ;;  %vm367_vm9 = vmor %vm365_vm7, %vm366_vm4 }
 0x14c   :  { %v440_v54 = vmul.f32 %v898_v52, %v348_v14  ;;  %v362_v19 = vmul.f32 0.5, %v361_v8  ;;  %v280_v52 = vmul.f32 %v644_v6, %v973_v46  ;;  %v358_v27 = vsel %vm1031_vm6, %v944_v15, %v354_v16 }
 0x14d   :  { %v312_v37 = vmul.f32 0.5, %v311_v21  ;;  %v372_v15 = vmul.f32 0.5, %v371_v5  ;;  %v278_v32 = vsel %vm1052_vm10, %v894_v49, %v274_v26  ;;  %v441_v48 = vmul.f32 %v425_v60, %v358_v27 }
 0x14e   :  { %v562_v23 = vpack.c.bf16 %v440_v54, %v439_v34  ;;  %v363_v7 = vsub.f32 1.5, %v362_v19  ;;  %v281_v56 = vmul.f32 %v644_v6, %v280_v52  ;;  %vm286_vm11 = vweird.f32 %v644_v6 }
 0x14f   :  { %v1041_v18 = vpop.eup %645  ;;  %v430_v28 = vmul.f32 %v859_v24, %v822_v61  ;;  %v313_v53 = vsub.f32 1.5, %v312_v37  ;;  %vm285_vm12 = vweird.f32 %v973_v46  ;;  %v373_v0 = vsub.f32 1.5, %v372_v15 }
 0x150   :  { %582 = vst [vmem:[#allocation8 + $0x20] sm:$0xff] %v562_v23   ;;  %v364_v17 = vmul.f32 %v977_v44, %v363_v7  ;;  %v228_v31 = vpop.xlane.xlu1 %227  ;;  %v282_v29 = vmul.f32 0.5, %v281_v56  ;;  %v390_v57 = vmul.f32 %v1041_v18, %v1000_v3  ;;  %v648_v22 = vpop.eup %647  ;;  %v433_v47 = vmul.f32 %v913_v59, %v278_v32  ;;  %vm287_vm14 = vmor %vm285_vm12, %vm286_vm11 }
 0x151   :  { %v1048_v38 = vadd.f32 1e-12, %v228_v31  ;;  %v400_v35 = vmul.f32 %v648_v22, %v1002_v51  ;;  %vm316_vm13 = vweird.f32 %v996_v1  ;;  %vm396_vm15 = vweird.f32 %v1041_v18 }
 0x152   :  { %v368_v36 = vsel %vm367_vm9, %v977_v44, %v364_v17  ;;  %v283_v58 = vsub.f32 1.5, %v282_v29  ;;  %v391_v45 = vmul.f32 %v1041_v18, %v390_v57  ;;  %v650_v44 = vpop.eup %649  ;;  %v314_v9 = vmul.f32 %v996_v1, %v313_v53 }
 0x153   :  { %v442_v41 = vmul.f32 %v426_v33, %v368_v36  ;;  %651 = vrsqrt.f32 %v1048_v38  ;;  %v401_v60 = vmul.f32 %v648_v22, %v400_v35  ;;  %v320_v10 = vmul.f32 %v650_v44, %v1023_v30 }
 0x154   :  { %v284_v62 = vmul.f32 %v644_v6, %v283_v58  ;;  %v392_v49 = vmul.f32 0.5, %v391_v45  ;;  %vm395_vm0 = vweird.f32 %v1000_v3  ;;  %vm406_vm1 = vweird.f32 %v648_v22 }
 0x155   :  { %v567_v43 = vpack.c.bf16 %v442_v41, %v441_v48  ;;  %v402_v5 = vmul.f32 0.5, %v401_v60  ;;  %v321_v8 = vmul.f32 %v650_v44, %v320_v10  ;;  %vm315_vm2 = vweird.f32 %v942_v13  ;;  %vm1080_vm3 = vmor %vm395_vm0, %vm396_vm15 }
 0x156   :  { %v288_v61 = vsel %vm287_vm14, %v644_v6, %v284_v62  ;;  %v393_v2 = vsub.f32 1.5, %v392_v49  ;;  %vm405_vm4 = vweird.f32 %v1002_v51  ;;  %vm326_vm5 = vweird.f32 %v650_v44  ;;  %vm1087_vm6 = vmor %vm315_vm2, %vm316_vm13 }
 0x157   :  { %583 = vst [vmem:[#allocation8 + $0x28] sm:$0xff] %v567_v43   ;;  %v434_v34 = vmul.f32 %v418_v11, %v288_v61  ;;  %v403_v12 = vsub.f32 1.5, %v402_v5  ;;  %v322_v14 = vmul.f32 0.5, %v321_v8  ;;  %v374_v7 = vmul.f32 %v962_v25, %v373_v0  ;;  %vm407_vm9 = vmor %vm405_vm4, %vm406_vm1 }
 0x158   :  { %v394_v59 = vmul.f32 %v1041_v18, %v393_v2  ;;  %vm375_vm7 = vweird.f32 %v882_v42  ;;  %vm376_vm8 = vweird.f32 %v962_v25  ;;  %vm325_vm10 = vweird.f32 %v1023_v30 }
 0x159   :  { %v652_v46 = vpop.eup %651  ;;  %v547_v16 = vpack.c.bf16 %v434_v34, %v433_v47  ;;  %v404_v6 = vmul.f32 %v648_v22, %v403_v12  ;;  %v323_v21 = vsub.f32 1.5, %v322_v14  ;;  %v318_v51 = vsel %vm1087_vm6, %v996_v1, %v314_v9  ;;  %vm327_vm11 = vmor %vm325_vm10, %vm326_vm5 }
 0x15a   :  { %v380_v54 = vmul.f32 %v652_v46, %v1048_v38  ;;  %v398_v13 = vsel %vm1080_vm3, %v1041_v18, %v394_v59  ;;  %v421_v39 = vmul.f32 %v859_v24, %v810_v55  ;;  %v422_v27 = vmul.f32 %v859_v24, %v826_v63  ;;  %vm1112_vm13 = vmor %vm375_vm7, %vm376_vm8 }
 0x15b   :  { %579 = vst [vmem:[#allocation8 + $0x8] sm:$0xff] %v547_v16   ;;  %v408_v52 = vsel %vm407_vm9, %v648_v22, %v404_v6  ;;  %v324_v11 = vmul.f32 %v650_v44, %v323_v21  ;;  %v445_v17 = vmul.f32 %v1006_v20, %v398_v13  ;;  %vm386_vm12 = vweird.f32 %v652_v46 }
 0x15c   :  { %v381_v23 = vmul.f32 %v652_v46, %v380_v54  ;;  %v446_v56 = vmul.f32 %v430_v28, %v408_v52  ;;  %v437_v55 = vmul.f32 %v421_v39, %v318_v51  ;;  %v378_v63 = vsel %vm1112_vm13, %v962_v25, %v374_v7 }
 0x15d   :  { %v328_v31 = vsel %vm327_vm11, %v650_v44, %v324_v11  ;;  %vm385_vm14 = vweird.f32 %v1048_v38  ;;  %v427_v37 = vmul.f32 %v859_v24, %v780_v40  ;;  %v428_v42 = vmul.f32 %v859_v24, %v800_v50 }
 0x15e   :  { %v382_v26 = vmul.f32 0.5, %v381_v23  ;;  %v577_v18 = vpack.c.bf16 %v446_v56, %v445_v17  ;;  %v438_v33 = vmul.f32 %v422_v27, %v328_v31  ;;  %vm387_vm15 = vmor %vm385_vm14, %vm386_vm12 }
 0x15f   :  { %v443_v25 = vmul.f32 %v427_v37, %v378_v63 }
 0x160   :  { %v383_v30 = vsub.f32 1.5, %v382_v26  ;;  %585 = vst [vmem:[#allocation8 + $0x38] sm:$0xff] %v577_v18   ;;  %v557_v15 = vpack.c.bf16 %v438_v33, %v437_v55 }
 0x162   :  { %v384_v20 = vmul.f32 %v652_v46, %v383_v30  ;;  %581 = vst [vmem:[#allocation8 + $0x18] sm:$0xff] %v557_v15  }
 0x164   :  { %v388_v4 = vsel %vm387_vm15, %v652_v46, %v384_v20 }
 0x165   :  { %v444_v36 = vmul.f32 %v428_v42, %v388_v4 }
 0x167   :  { %v572_v38 = vpack.c.bf16 %v444_v36, %v443_v25 }
 0x169   :  { %584 = vst [vmem:[#allocation8 + $0x30] sm:$0xff] %v572_v38  }
 0x16a   :  { %491 = dma.vmem_to_hbm [thread:$0]  %s484_s27, 1024, %s486_s30, [#allocation5], %s735_s24, %s735_s24, %s736_s25  }
 0x16b   :  { %729 = dma.done.wait [#allocation5], 1024  }
 0x16c   :  { %730 = vsyncadd [#allocation5], 4294966272 }
 0x16d   :  { %496 = vsyncpa [#allocation4], 1 }
 0x16e   :  { %497 = vsyncpa [#allocation7], 1 }
 0x16f   :  { %498 = vsyncpa [#allocation5], 1 }

</bundles_post_ra>
